<compile_context>
chip_gen: v7x
topology: tpu7x:2x2x1
jax: 0.10.0
libtpu: 0.0.40
codegen_flags: <defaults>
</compile_context>

<pallas_src>
import functools

import jax
import jax.numpy as jnp
from jax.experimental import pallas as pl
from jax.experimental.pallas import tpu as pltpu

LANE = 128      # lane width (last dim)
SUBLANE = 8     # sublane width (second-to-last dim)


def _round_up(x, m):
    return ((x + m - 1) // m) * m


def _cdiv(a, b):
    return (a + b - 1) // b


# --------------------------------------------------------------------------- kernel
def mlp_policy_kernel(x_ref, w1_ref, b1_ref, w2_ref, b2_ref, w3_ref, b3_ref, o_ref):
    # Layer 1: Linear + ReLU  (bf16 MXU operands, f32 accumulation)
    x = x_ref[...].astype(jnp.bfloat16)
    h1 = jnp.dot(x, w1_ref[...], preferred_element_type=jnp.float32) + b1_ref[...]
    h1 = jnp.maximum(h1, 0.0)
    # Layer 2: Linear + ReLU
    h2 = jnp.dot(h1.astype(jnp.bfloat16), w2_ref[...],
                 preferred_element_type=jnp.float32) + b2_ref[...]
    h2 = jnp.maximum(h2, 0.0)
    # Output layer: Linear + Tanh
    out = jnp.dot(h2.astype(jnp.bfloat16), w3_ref[...],
                  preferred_element_type=jnp.float32) + b3_ref[...]
    o_ref[...] = jnp.tanh(out).astype(o_ref.dtype)


# --------------------------------------------------------------------- param prep
def prepare_params(params):
    """Pad the hidden dim to a lane multiple and cast weights to bf16.

    Call ONCE (e.g. after init / weight update) and reuse the result for every
    forward call; this keeps pad/cast traffic out of the inference path.
    Zero padding is exact: padded hidden units get zero weight + zero bias, so
    they are ReLU(0)=0 and contribute nothing downstream.
    """
    obs_dim, hidden_dim = params["w1"].shape
    act_dim = params["w3"].shape[1]
    hid_p = _round_up(hidden_dim, LANE)

    def pad2(a, rows, cols, dtype):
        r, c = a.shape
        return jnp.pad(a, ((0, rows - r), (0, cols - c))).astype(dtype)

    return {
        "w1": pad2(params["w1"], obs_dim, hid_p, jnp.bfloat16),
        "b1": pad2(params["b1"], 1, hid_p, jnp.float32),
        "w2": pad2(params["w2"], hid_p, hid_p, jnp.bfloat16),
        "b2": pad2(params["b2"], 1, hid_p, jnp.float32),
        "w3": pad2(params["w3"], hid_p, act_dim, jnp.bfloat16),
        "b3": pad2(params["b3"], 1, act_dim, jnp.float32),
    }


def _batch_tiling(B, block_b):
    """Even-split batch tiling: never pads up to ~2x work, and prefers an even
    number of grid steps (when B is big enough) so both v7x TensorCores get work.
    No-op on v5e/v6e (single TC)."""
    n_tiles = max(_cdiv(B, block_b), 1)
    if B >= 2 * SUBLANE and n_tiles % 2 == 1:
        n_tiles += 1
    tb = _round_up(_cdiv(B, n_tiles), SUBLANE)
    b_pad = n_tiles * tb
    return tb, n_tiles, b_pad


# ------------------------------------------------------------------------ forward
@functools.partial(jax.jit, static_argnames=("block_b",))
def deterministic_policy_forward(obs, pparams, block_b=1024):
    """obs: (B, obs_dim) float32.  pparams: output of prepare_params()."""
    B, obs_dim = obs.shape
    hid_p = pparams["w1"].shape[1]
    act_dim = pparams["w3"].shape[1]

    tb, n_tiles, b_pad = _batch_tiling(B, block_b)

    x = obs.astype(jnp.float32)
    if b_pad != B:
        # Only the batch axis is padded (zeros); padded rows are dropped below.
        x = jnp.pad(x, ((0, b_pad - B), (0, 0)))

    flops = 2 * b_pad * (obs_dim * hid_p + hid_p * hid_p + hid_p * act_dim)
    bytes_accessed = (
        b_pad * obs_dim * 4                                   # obs (f32)
        + b_pad * act_dim * 4                                 # output (f32)
        + (obs_dim * hid_p + hid_p * hid_p + hid_p * act_dim) * 2  # weights (bf16)
        + (2 * hid_p + act_dim) * 4)                          # biases (f32)
    cost = pl.CostEstimate(flops=flops,
                           transcendentals=b_pad * act_dim,   # tanh
                           bytes_accessed=bytes_accessed)

    const = lambda i: (0, 0)  # weights/biases stay resident across the batch grid

    out = pl.pallas_call(
        mlp_policy_kernel,
        out_shape=jax.ShapeDtypeStruct((b_pad, act_dim), jnp.float32),
        grid_spec=pltpu.PrefetchScalarGridSpec(
            num_scalar_prefetch=0,
            grid=(n_tiles,),
            in_specs=[
                pl.BlockSpec((tb, obs_dim), lambda i: (i, 0)),   # obs tile (native width)
                pl.BlockSpec((obs_dim, hid_p), const),           # w1 (bf16)
                pl.BlockSpec((1, hid_p), const),                 # b1 (f32)
                pl.BlockSpec((hid_p, hid_p), const),             # w2 (bf16)
                pl.BlockSpec((1, hid_p), const),                 # b2 (f32)
                pl.BlockSpec((hid_p, act_dim), const),           # w3 (bf16)
                pl.BlockSpec((1, act_dim), const),               # b3 (f32)
            ],
            out_specs=pl.BlockSpec((tb, act_dim), lambda i: (i, 0)),  # native width out
        ),
        compiler_params=pltpu.CompilerParams(
            dimension_semantics=("parallel",),
        ),
        cost_estimate=cost,
    )(x, pparams["w1"], pparams["b1"], pparams["w2"], pparams["b2"],
      pparams["w3"], pparams["b3"])

    if b_pad != B:
        out = out[:B]
    return out


# --------------------------------------------------------------------------- setup
def init_params(key, obs_dim, act_dim, hidden_dim):
    """Init mimicking PyTorch nn.Linear default (U[-1/sqrt(fan_in), 1/sqrt(fan_in)]).
    Weights stored as (in, out) == W_pt.T so the kernel computes x @ W + b."""
    sizes = [obs_dim, hidden_dim, hidden_dim, act_dim]
    params = {}
    keys = jax.random.split(key, 6)
    for i in range(3):
        fan_in = sizes[i]
        bound = 1.0 / (fan_in ** 0.5)
        params[f"w{i+1}"] = jax.random.uniform(
            keys[2 * i], (sizes[i], sizes[i + 1]), jnp.float32, -bound, bound)
        params[f"b{i+1}"] = jax.random.uniform(
            keys[2 * i + 1], (1, sizes[i + 1]), jnp.float32, -bound, bound)
    return params


def reference_forward(obs, params):
    h1 = jnp.maximum(obs @ params["w1"] + params["b1"], 0.0)
    h2 = jnp.maximum(h1 @ params["w2"] + params["b2"], 0.0)
    return jnp.tanh(h2 @ params["w3"] + params["b3"])


if __name__ == "__main__":
    # Small shapes consistent with the module: obs_dim=16, act_dim=8, hidden_dim=32
    B, OBS_DIM, ACT_DIM, HIDDEN = 8, 16, 8, 32

    key = jax.random.PRNGKey(0)
    k_obs, k_params, k_obs2 = jax.random.split(key, 3)
    obs = jax.random.normal(k_obs, (B, OBS_DIM), jnp.float32)
    params = init_params(k_params, OBS_DIM, ACT_DIM, HIDDEN)
    pparams = prepare_params(params)   # pad + bf16-cast ONCE, reused for every call

    out = jax.block_until_ready(deterministic_policy_forward(obs, pparams))
    ref = reference_forward(obs, params)
    assert out.shape == (B, ACT_DIM), out.shape
    # bf16 MXU operands with f32 accumulation -> loose tolerance vs. the f32 reference.
    assert jnp.allclose(out, ref, atol=2e-2), "mismatch vs reference (small batch)"
    assert bool(jnp.all(jnp.abs(out) <= 1.0)), "tanh output out of range"

    # Exercise the multi-tile batch grid (even tile count for v7x) + batch-padding path.
    B2 = 300
    obs2 = jax.random.normal(k_obs2, (B2, OBS_DIM), jnp.float32)
    out2 = jax.block_until_ready(deterministic_policy_forward(obs2, pparams))
    ref2 = reference_forward(obs2, params)
    assert out2.shape == (B2, ACT_DIM), out2.shape
    assert jnp.allclose(out2, ref2, atol=2e-2), "mismatch vs reference (gridded batch)"

    print("KERNEL_OK")
</pallas_src>

<mosaic_0001>
module attributes {stable_mosaic.version = 11 : i64} {
  func.func @mlp_policy_kernel(%arg0: i32, %arg1: memref<8x16xf32, #tpu.memory_space<vmem>>, %arg2: memref<16x128xbf16, #tpu.memory_space<vmem>>, %arg3: memref<1x128xf32, #tpu.memory_space<vmem>>, %arg4: memref<128x128xbf16, #tpu.memory_space<vmem>>, %arg5: memref<1x128xf32, #tpu.memory_space<vmem>>, %arg6: memref<128x8xbf16, #tpu.memory_space<vmem>>, %arg7: memref<1x8xf32, #tpu.memory_space<vmem>>, %arg8: memref<8x8xf32, #tpu.memory_space<vmem>>) attributes {dimension_semantics = [#tpu.dimension_semantics<parallel>], iteration_bounds = array<i64: 1>, scalar_prefetch = 0 : i64, scratch_operands = 0 : i64, tpu.core_type = #tpu.core_type<tc>, window_params = [{transform_indices = @transform_0, window_bounds = array<i64: 8, 16>}, {pipeline_mode = #tpu.pipeline_mode<synchronous>, transform_indices = @transform_1, window_bounds = array<i64: 16, 128>}, {pipeline_mode = #tpu.pipeline_mode<synchronous>, transform_indices = @transform_2, window_bounds = array<i64: 1, 128>}, {pipeline_mode = #tpu.pipeline_mode<synchronous>, transform_indices = @transform_3, window_bounds = array<i64: 128, 128>}, {pipeline_mode = #tpu.pipeline_mode<synchronous>, transform_indices = @transform_4, window_bounds = array<i64: 1, 128>}, {pipeline_mode = #tpu.pipeline_mode<synchronous>, transform_indices = @transform_5, window_bounds = array<i64: 128, 8>}, {pipeline_mode = #tpu.pipeline_mode<synchronous>, transform_indices = @transform_6, window_bounds = array<i64: 1, 8>}, {transform_indices = @transform_7, window_bounds = array<i64: 8, 8>}]} {
    %c0 = arith.constant 0 : index
    %c0_0 = arith.constant 0 : index
    %0 = vector.load %arg1[%c0, %c0_0] : memref<8x16xf32, #tpu.memory_space<vmem>>, vector<8x16xf32>
    %1 = arith.truncf %0 : vector<8x16xf32> to vector<8x16xbf16>
    %c0_1 = arith.constant 0 : index
    %c0_2 = arith.constant 0 : index
    %2 = vector.load %arg2[%c0_1, %c0_2] : memref<16x128xbf16, #tpu.memory_space<vmem>>, vector<16x128xbf16>
    %cst = arith.constant dense<0.000000e+00> : vector<8x128xf32>
    %3 = tpu.matmul %1, %2, %cst {dimension_numbers = #tpu.dot_dimension_numbers<[1], [0], [0], [1], [0, 0, 1, 1], [], []>} : vector<8x16xbf16>, vector<16x128xbf16>, vector<8x128xf32> -> vector<8x128xf32>
    %c0_3 = arith.constant 0 : index
    %c0_4 = arith.constant 0 : index
    %4 = vector.load %arg3[%c0_3, %c0_4] : memref<1x128xf32, #tpu.memory_space<vmem>>, vector<1x128xf32>
    %5 = vector.broadcast %4 : vector<1x128xf32> to vector<8x128xf32>
    %6 = arith.addf %3, %5 : vector<8x128xf32>
    %cst_5 = arith.constant 0.000000e+00 : f32
    %7 = vector.broadcast %cst_5 : f32 to vector<8x128xf32>
    %8 = arith.maximumf %6, %7 : vector<8x128xf32>
    %9 = arith.truncf %8 : vector<8x128xf32> to vector<8x128xbf16>
    %c0_6 = arith.constant 0 : index
    %c0_7 = arith.constant 0 : index
    %10 = vector.load %arg4[%c0_6, %c0_7] : memref<128x128xbf16, #tpu.memory_space<vmem>>, vector<128x128xbf16>
    %cst_8 = arith.constant dense<0.000000e+00> : vector<8x128xf32>
    %11 = tpu.matmul %9, %10, %cst_8 {dimension_numbers = #tpu.dot_dimension_numbers<[1], [0], [0], [1], [0, 0, 1, 1], [], []>} : vector<8x128xbf16>, vector<128x128xbf16>, vector<8x128xf32> -> vector<8x128xf32>
    %c0_9 = arith.constant 0 : index
    %c0_10 = arith.constant 0 : index
    %12 = vector.load %arg5[%c0_9, %c0_10] : memref<1x128xf32, #tpu.memory_space<vmem>>, vector<1x128xf32>
    %13 = vector.broadcast %12 : vector<1x128xf32> to vector<8x128xf32>
    %14 = arith.addf %11, %13 : vector<8x128xf32>
    %cst_11 = arith.constant 0.000000e+00 : f32
    %15 = vector.broadcast %cst_11 : f32 to vector<8x128xf32>
    %16 = arith.maximumf %14, %15 : vector<8x128xf32>
    %17 = arith.truncf %16 : vector<8x128xf32> to vector<8x128xbf16>
    %c0_12 = arith.constant 0 : index
    %c0_13 = arith.constant 0 : index
    %18 = vector.load %arg6[%c0_12, %c0_13] : memref<128x8xbf16, #tpu.memory_space<vmem>>, vector<128x8xbf16>
    %cst_14 = arith.constant dense<0.000000e+00> : vector<8x8xf32>
    %19 = tpu.matmul %17, %18, %cst_14 {dimension_numbers = #tpu.dot_dimension_numbers<[1], [0], [0], [1], [0, 0, 1, 1], [], []>} : vector<8x128xbf16>, vector<128x8xbf16>, vector<8x8xf32> -> vector<8x8xf32>
    %c0_15 = arith.constant 0 : index
    %c0_16 = arith.constant 0 : index
    %20 = vector.load %arg7[%c0_15, %c0_16] : memref<1x8xf32, #tpu.memory_space<vmem>>, vector<1x8xf32>
    %21 = vector.broadcast %20 : vector<1x8xf32> to vector<8x8xf32>
    %22 = arith.addf %19, %21 : vector<8x8xf32>
    %23 = math.tanh %22 : vector<8x8xf32>
    %c0_17 = arith.constant 0 : index
    %c0_18 = arith.constant 0 : index
    %24 = vector.load %arg8[%c0_17, %c0_18] : memref<8x8xf32, #tpu.memory_space<vmem>>, vector<8x8xf32>
    tpu.vector_store %arg8[%c0_17, %c0_18], %23 {strides = array<i32>} : memref<8x8xf32, #tpu.memory_space<vmem>>, vector<8x8xf32>,
    return
  }
  func.func @transform_0(%arg0: i32) -> (i32, i32) {
    %c0_i32 = arith.constant 0 : i32
    %c0_i32_0 = arith.constant 0 : i32
    return %arg0, %c0_i32 : i32, i32
  }
  func.func @transform_1(%arg0: i32) -> (i32, i32) {
    %c0_i32 = arith.constant 0 : i32
    %c0_i32_0 = arith.constant 0 : i32
    %c0_i32_1 = arith.constant 0 : i32
    return %c0_i32, %c0_i32_0 : i32, i32
  }
  func.func @transform_2(%arg0: i32) -> (i32, i32) {
    %c0_i32 = arith.constant 0 : i32
    %c0_i32_0 = arith.constant 0 : i32
    %c0_i32_1 = arith.constant 0 : i32
    return %c0_i32, %c0_i32_0 : i32, i32
  }
  func.func @transform_3(%arg0: i32) -> (i32, i32) {
    %c0_i32 = arith.constant 0 : i32
    %c0_i32_0 = arith.constant 0 : i32
    %c0_i32_1 = arith.constant 0 : i32
    return %c0_i32, %c0_i32_0 : i32, i32
  }
  func.func @transform_4(%arg0: i32) -> (i32, i32) {
    %c0_i32 = arith.constant 0 : i32
    %c0_i32_0 = arith.constant 0 : i32
    %c0_i32_1 = arith.constant 0 : i32
    return %c0_i32, %c0_i32_0 : i32, i32
  }
  func.func @transform_5(%arg0: i32) -> (i32, i32) {
    %c0_i32 = arith.constant 0 : i32
    %c0_i32_0 = arith.constant 0 : i32
    %c0_i32_1 = arith.constant 0 : i32
    return %c0_i32, %c0_i32_0 : i32, i32
  }
  func.func @transform_6(%arg0: i32) -> (i32, i32) {
    %c0_i32 = arith.constant 0 : i32
    %c0_i32_0 = arith.constant 0 : i32
    %c0_i32_1 = arith.constant 0 : i32
    return %c0_i32, %c0_i32_0 : i32, i32
  }
  func.func @transform_7(%arg0: i32) -> (i32, i32) {
    %c0_i32 = arith.constant 0 : i32
    %c0_i32_0 = arith.constant 0 : i32
    return %arg0, %c0_i32 : i32, i32
  }
}

</mosaic_0001>

<bundles_post_ra>
// kernel: deterministic_policy_forward.1
= control target key start
LH: loop header
LB: loop body
LE: loop exit
PB: predicated region body
PF: predicated region fallthrough
CT: control target
= control target key end

     0   :  { %v465_v1 = vmov 0.0   ;;  %vm45_vm0 = vcmask 130048   ;;  %vm466_vm1 = vmmov 0   ;;  %s603_s0 = inlined_call_operand.vmem [shape: f32[8,16], index: 0, kind: input, shape index: {}]   ;;  %s604_s1 = inlined_call_operand.vmem [shape: bf16[16,128], index: 1, kind: input, shape index: {}]   ;;  %s605_s2 = inlined_call_operand.vmem [shape: f32[1,128], index: 2, kind: input, shape index: {}]   ;;  %s606_s3 = inlined_call_operand.vmem [shape: bf16[128,128], index: 3, kind: input, shape index: {}]   ;;  %s607_s4 = inlined_call_operand.vmem [shape: f32[1,128], index: 4, kind: input, shape index: {}]   ;;  %s608_s5 = inlined_call_operand.vmem [shape: bf16[128,8], index: 5, kind: input, shape index: {}]   ;;  %s609_s6 = inlined_call_operand.vmem [shape: f32[1,8], index: 6, kind: input, shape index: {}]   ;;  %s610_s7 = inlined_call_operand.hbm [shape: f32[8,8], index: 7, kind: output, shape index: {}]  }
   0x1   :  { %v422_v0 = vld [vmem:[%s604_s1] sm:$0xff]   ;;  %373 = vmatprep.subr.bf16.mxu0 %v465_v1  ;;  %379 = vmatprep.subr.bf16.mxu1 %v465_v1  ;;  %v424_v5 = vld [vmem:[%s606_s3 + $0x8] sm:$0xff]   ;;  %v425_v6 = vld [vmem:[%s606_s3 + $0x10] sm:$0xff]  }
   0x2   :  { %v28_v2 = vld [vmem:[%s603_s0] sm:$0xff]  ;;  %374 = vmatpush3.bf16.msra.mxu0 %v422_v0  ;;  %375 = vmatprep.mubr.msk.bf16.mxu0 %vm466_vm1, %v465_v1  ;;  %v426_v7 = vld [vmem:[%s606_s3 + $0x18] sm:$0xff]  }
   0x3   :  { %v423_v3 = vld [vmem:[%s606_s3] sm:$0xff]   ;;  %v29_v4 = vpack.c.bf16 %v28_v2, %v28_v2  ;;  %395 = vmatprep.mubr.msk.bf16.mxu1 %vm466_vm1, %v465_v1  ;;  %399 = vmatprep.subr.bf16.mxu0 %v465_v1 }
   0x4   :  { %380 = vmatpush3.bf16.msra.mxu1 %v423_v3 }
   0x5   :  { %381 = vmatprep.subr.bf16.mxu1 %v465_v1  ;;  %376 = vmatmul.mubr.msk.bf16.vlgmr.msra.gmra.mrb[0].mxu0 %vm45_vm0, %v29_v4 }
   0x6   :  { %415 = vmatprep.mubr.msk.bf16.mxu0 %vm466_vm1, %v465_v1 }
   0x8   :  { %382 = vmatpush3.bf16.msra.mxu1 %v424_v5 }
   0x9   :  { %383 = vmatprep.subr.bf16.mxu1 %v465_v1 }
   0xc   :  { %384 = vmatpush3.bf16.msra.mxu1 %v425_v6 }
   0xd   :  { %385 = vmatprep.subr.bf16.mxu1 %v465_v1 }
   0xe   :  { %12 = vsyncpa [#allocation3], 0  ;;  %v427_v8 = vld [vmem:[%s606_s3 + $0x20] sm:$0xff]   ;;  %v428_v9 = vld [vmem:[%s606_s3 + $0x28] sm:$0xff]   ;;  %vm316_vm2 = vcmask 64512  }
   0xf   :  { %v429_v10 = vld [vmem:[%s606_s3 + $0x30] sm:$0xff]   ;;  %v430_v11 = vld [vmem:[%s606_s3 + $0x38] sm:$0xff]   ;;  %v431_v12 = vld [vmem:[%s608_s5] sm:$0xff]  }
  0x10   :  { %386 = vmatpush3.bf16.msra.mxu1 %v426_v7  ;;  %400 = vmatpush3.bf16.msra.mxu0 %v431_v12  ;;  %v432_v13 = vld [vmem:[%s608_s5 + $0x8] sm:$0xff]   ;;  %v433_v14 = vld [vmem:[%s608_s5 + $0x10] sm:$0xff]   ;;  %v434_v15 = vld [vmem:[%s608_s5 + $0x18] sm:$0xff]  }
  0x11   :  { %387 = vmatprep.subr.bf16.mxu1 %v465_v1  ;;  %401 = vmatprep.subr.bf16.mxu0 %v465_v1  ;;  %v435_v16 = vld [vmem:[%s608_s5 + $0x20] sm:$0xff]   ;;  %v436_v17 = vld [vmem:[%s608_s5 + $0x28] sm:$0xff]   ;;  %v437_v26 = vld [vmem:[%s608_s5 + $0x30] sm:$0xff]  }
  0x12   :  { %v332_v18 = vld [vmem:[%s605_s2] ss:$0 sm:$0xff]  ;;  %v438_v27 = vld [vmem:[%s608_s5 + $0x38] sm:$0xff]   ;;  %s467_s5 = smov [#allocation2]  }
  0x13   :  { %v335_v28 = vld [vmem:[%s607_s4] ss:$0 sm:$0xff]  ;;  %s324_s4 = sshll.u32 %s467_s5, 4  ;;  %s325_s4 = int_to_ptr.vmem [resolvable:$true] %s324_s4 }
  0x14   :  { %388 = vmatpush3.bf16.msra.mxu1 %v427_v8  ;;  %402 = vmatpush3.bf16.msra.mxu0 %v432_v13  ;;  %v344_v36 = vld [vmem:[%s609_s6] ss:$0 sm:$0xff]  ;;  %s441_s14 = scalar_lea.vmem %s325_s4, 128  ;;  %p446_p1 = scmp.lt.s32.totalorder %s325_s4, %s325_s4 }
  0x15   :  { %389 = vmatprep.subr.bf16.mxu1 %v465_v1  ;;  %403 = vmatprep.subr.bf16.mxu0 %v465_v1  ;;  %p442_p0 = scmp.ne.s32.totalorder %s325_s4, %s441_s14  ;;  %p447_p2 = scmp.lt.s32.totalorder %s441_s14, %s441_s14 }
  0x17   :  { %p448_p3 = por %p447_p2, %p446_p1 }
  0x18   :  { %390 = vmatpush3.bf16.msra.mxu1 %v428_v9  ;;  %404 = vmatpush3.bf16.msra.mxu0 %v433_v14 }
  0x19   :  { %391 = vmatprep.subr.bf16.mxu1 %v465_v1  ;;  %405 = vmatprep.subr.bf16.mxu0 %v465_v1  ;;  %p449_p4 = pnand %p448_p3, %p442_p0 }
  0x1c   :  { %392 = vmatpush3.bf16.msra.mxu1 %v429_v10  ;;  %406 = vmatpush3.bf16.msra.mxu0 %v434_v15 }
  0x1d   :  { %393 = vmatprep.subr.bf16.mxu1 %v465_v1  ;;  %407 = vmatprep.subr.bf16.mxu0 %v465_v1 }
  0x20   :  { %394 = vmatpush3.bf16.msra.mxu1 %v430_v11  ;;  %408 = vmatpush3.bf16.msra.mxu0 %v435_v16 }
  0x21   :  { %409 = vmatprep.subr.bf16.mxu0 %v465_v1 }
  0x24   :  { %410 = vmatpush3.bf16.msra.mxu0 %v436_v17 }
  0x25   :  { %411 = vmatprep.subr.bf16.mxu0 %v465_v1 }
  0x28   :  { %412 = vmatpush3.bf16.msra.mxu0 %v437_v26 }
  0x29   :  { %413 = vmatprep.subr.bf16.mxu0 %v465_v1 }
  0x2c   :  { %414 = vmatpush3.bf16.msra.mxu0 %v438_v27 }
  0xd8   :  { %v83_v19 = vpop.f32.mrb[0].mxu0 }
  0xd9   :  { %v84_v20 = vadd.f32 %v332_v18, %v83_v19  ;;  %v377_v21 = vpop.f32.mrb[1].mxu0 }
  0xda   :  { %v86_v22 = vpop.f32.mrb[2].mxu0 }
  0xdb   :  { %v89_v23 = vmax.f32 %v84_v20, 0.0  ;;  %v378_v24 = vpop.f32.mrb[3].mxu0 }
  0xdd   :  { %v90_v25 = vpack.c.bf16 %v89_v23, %v89_v23 }
  0xdf   :  { %396 = vmatmul.mubr.bf16.vlgmr.msra.gmra.mrb[0].mxu1 %v90_v25 }
 0x1b2   :  { %v196_v29 = vpop.f32.mrb[0].mxu1 }
 0x1b3   :  { %v197_v30 = vadd.f32 %v335_v28, %v196_v29  ;;  %v397_v31 = vpop.f32.mrb[1].mxu1 }
 0x1b4   :  { %v199_v32 = vpop.f32.mrb[2].mxu1 }
 0x1b5   :  { %v202_v33 = vmax.f32 %v197_v30, 0.0  ;;  %v398_v34 = vpop.f32.mrb[3].mxu1 }
 0x1b7   :  { %v203_v35 = vpack.c.bf16 %v202_v33, %v202_v33 }
 0x1b9   :  { %416 = vmatmul.mubr.bf16.vlgmr.msra.gmra.mrb[4].mxu0 %v203_v35 }
 0x28c   :  { %v309_v37 = vpop.f32.mrb[4].mxu0 }
 0x28d   :  { %v310_v38 = vadd.f32 %v344_v36, %v309_v37  ;;  %v417_v39 = vpop.f32.mrb[5].mxu0 }
 0x28e   :  { %v312_v40 = vpop.f32.mrb[6].mxu0 }
 0x28f   :  { %439 = vtanh.f32 %v310_v38  ;;  %v418_v41 = vpop.f32.mrb[7].mxu0 }
 0x299   :  { %v440_v42 = vpop.eup %439 }
 0x29a   :  { %317 = vst.msk [vmem:[#allocation2] sm:$0xff] %vm316_vm2, %v440_v42 }
 0x29b   :  { %452 = shalt.err (!%p449_p4)
}
 0x29c   :  { %s453_s16 = scalar_lea.hbm %s610_s7, 128 }
 0x29d   :  { %p454_p5 = scmp.ne.s32.totalorder %s610_s7, %s453_s16  ;;  %p457_p6 = scmp.lt.u32.totalorder %s453_s16, %s610_s7 }
 0x29f   :  { %p459_p7 = pnand %p457_p6, %p454_p5 }
 0x2a1   :  { %462 = shalt.err (!%p459_p7)
}
 0x2a2   :  { %327 = dma.vmem_to_hbm [thread:$0]  %s325_s4, 128, %s610_s7, [#allocation3]  }
 0x2a3   :  { %463 = dma.done.wait [#allocation3], 128  }
 0x2a4   :  { %464 = vsyncadd [#allocation3], 4294967168 }
 0x2a5   :  { %331 = vsyncpa [#allocation3], 1 }

</bundles_post_ra>
